<compile_context>
chip_gen: v7x
topology: tpu7x:2x2x1
jax: 0.10.0
libtpu: 0.0.40
codegen_flags: <defaults>
</compile_context>

<pallas_src>
import numpy as np
import jax
import jax.numpy as jnp
from jax import lax
from jax.experimental import pallas as pl
from jax.experimental.pallas import tpu as pltpu

# ---------------- model hyper-parameters (small, consistent with the module) ------
B = 2                   # batch
V = 8                   # n_vertices
D = 32                  # per-token feature dim  (= in_channels // 2)
IN_CH = 2 * D           # conv1 in_channels = 64
C1, C2, C3 = 256, 128, 64   # hard-coded conv channel widths of ScoreNet
S = 2 * V + 1           # tokens incl. CLS = 17
BV = B * V              # 16
BVV = B * V * V         # 128
BN_EPS = 1e-5           # nn.BatchNorm2d default


# ---------------- constant selection matrices (built once, host-side) -------------
def _build_pair_matrix() -> jnp.ndarray:
    """(B*V, B*S): row b*V+m averages tokens (1+2m, 2+2m) of batch b (drops CLS)."""
    m = np.zeros((BV, B * S), np.float32)
    for b in range(B):
        for t in range(V):
            m[b * V + t, b * S + 1 + 2 * t] = 0.5
            m[b * V + t, b * S + 2 + 2 * t] = 0.5
    return jnp.asarray(m)


def _build_pair_selectors() -> jnp.ndarray:
    """(2*B*V*V, B*V) 0/1 matrix.  For output pixel r = b*V*V + i*V + j,
    row r picks fm[b, i] (left half of the concat) and row BVV+r picks fm[b, j]
    (the transposed half) -- i.e. the repeat/transpose/cat of the reference."""
    s = np.zeros((2 * BVV, BV), np.float32)
    for b in range(B):
        for i in range(V):
            for j in range(V):
                r = b * V * V + i * V + j
                s[r, b * V + i] = 1.0
                s[BVV + r, b * V + j] = 1.0
    return jnp.asarray(s)


_PAIR_MAT = _build_pair_matrix()
_SEL_MAT = _build_pair_selectors()


# ---------------- Pallas kernel ----------------------------------------------------
def scorenet_kernel(feats_ref, pairm_ref, sel_ref, w1_ref, w2_ref, w3_ref,
                    w4_ref, bias_ref, out_ref):
    f32 = jnp.float32
    bf16 = jnp.bfloat16

    bias = bias_ref[...]                                     # (4, C1) f32 slab

    # feats[:, 1:] + mean over adjacent token pairs, as one MXU matmul with a
    # block-diagonal 0.5-selection matrix (also folds the batch dim into rows).
    fm = jnp.dot(pairm_ref[...], feats_ref[...],
                 preferred_element_type=f32)                 # (B*V, D) f32
    fm_bf = fm.astype(bf16)

    # conv1 on concat([fm_i, fm_j]) == fm_i @ W1[:D] + fm_j @ W1[D:]  (BN1 folded).
    w1 = w1_ref[...]                                         # (2D, C1) bf16
    a = jnp.dot(fm_bf, w1[:D, :], preferred_element_type=f32) + bias[0:1, :]   # (B*V, C1)
    c = jnp.dot(fm_bf, w1[D:, :], preferred_element_type=f32)                  # (B*V, C1)

    # Pairwise repeat / transpose / cat of the reference as two 0/1 row-selection
    # matmuls -> (B*V*V, C1) without any sublane shuffles / concatenations.
    sel = sel_ref[...]                                       # (2*B*V*V, B*V) f32
    h = (jnp.dot(sel[:BVV, :], a, preferred_element_type=f32)
         + jnp.dot(sel[BVV:, :], c, preferred_element_type=f32))
    h = jnp.maximum(h, 0.0)                                  # relu(bn1(conv1(x)))

    # conv2 + bn2 + relu   (BN folded; bf16 operands, f32 accumulation)
    h = jnp.dot(h.astype(bf16), w2_ref[...], preferred_element_type=f32) + bias[1:2, :C2]
    h = jnp.maximum(h, 0.0)                                  # (B*V*V, C2)

    # conv3 + bn3 + relu
    h = jnp.dot(h.astype(bf16), w3_ref[...], preferred_element_type=f32) + bias[2:3, :C3]
    h = jnp.maximum(h, 0.0)                                  # (B*V*V, C3)

    # conv4 (single output channel), contracted so the result is lane-dense (1, B*V*V).
    o = lax.dot_general(w4_ref[...], h.astype(bf16),
                        dimension_numbers=(((1,), (1,)), ((), ())),
                        preferred_element_type=f32) + bias[3:4, 0:1]
    out_ref[...] = o                                         # (1, 128) f32


# ---------------- parameter init & BN folding --------------------------------------
def init_params(key):
    ks = jax.random.split(key, 12)

    def w(k, cin, cout):
        return jax.random.normal(k, (cin, cout), jnp.float32) * (cin ** -0.5)

    def bn(k, c):
        k1, k2, k3, k4 = jax.random.split(k, 4)
        return dict(gamma=1.0 + 0.1 * jax.random.normal(k1, (c,), jnp.float32),
                    beta=0.1 * jax.random.normal(k2, (c,), jnp.float32),
                    mean=0.1 * jax.random.normal(k3, (c,), jnp.float32),
                    var=0.5 + jax.random.uniform(k4, (c,), jnp.float32))

    return dict(
        w1=w(ks[0], IN_CH, C1), b1=0.01 * jax.random.normal(ks[1], (C1,), jnp.float32),
        w2=w(ks[2], C1, C2),    b2=0.01 * jax.random.normal(ks[3], (C2,), jnp.float32),
        w3=w(ks[4], C2, C3),    b3=0.01 * jax.random.normal(ks[5], (C3,), jnp.float32),
        w4=w(ks[6], C3, 1),     b4=0.01 * jax.random.normal(ks[7], (1,), jnp.float32),
        bn1=bn(ks[8], C1), bn2=bn(ks[9], C2), bn3=bn(ks[10], C3),
    )


def _fold_bn(w, b, bnp):
    s = bnp['gamma'] / jnp.sqrt(bnp['var'] + BN_EPS)
    return w * s[None, :], (b - bnp['mean']) * s + bnp['beta']


# ---------------- wrapper ------------------------------------------------------------
def scorenet_forward(feats, params):
    w1f, b1f = _fold_bn(params['w1'], params['b1'], params['bn1'])
    w2f, b2f = _fold_bn(params['w2'], params['b2'], params['bn2'])
    w3f, b3f = _fold_bn(params['w3'], params['b3'], params['bn3'])

    # pack all biases into a single (4, C1) slab (one DMA instead of four).
    bias_all = jnp.zeros((4, C1), jnp.float32)
    bias_all = bias_all.at[0, :C1].set(b1f)
    bias_all = bias_all.at[1, :C2].set(b2f)
    bias_all = bias_all.at[2, :C3].set(b3f)
    bias_all = bias_all.at[3, 0].set(params['b4'][0])

    feats2d = feats.reshape(B * S, D)          # fold batch into the row axis

    inputs = (feats2d,
              _PAIR_MAT,                       # (B*V, B*S)       f32
              _SEL_MAT,                        # (2*B*V*V, B*V)   f32
              w1f.astype(jnp.bfloat16),        # (2D, C1)
              w2f.astype(jnp.bfloat16),        # (C1, C2)
              w3f.astype(jnp.bfloat16),        # (C2, C3)
              params['w4'].T.astype(jnp.bfloat16),   # (1, C3)
              bias_all)                        # (4, C1)          f32

    vmem = pl.BlockSpec(memory_space=pltpu.MemorySpace.VMEM)
    out = pl.pallas_call(
        scorenet_kernel,
        out_shape=jax.ShapeDtypeStruct((1, BVV), jnp.float32),   # lane-dense (1, 128)
        in_specs=[vmem] * len(inputs),
        out_specs=vmem,
    )(*inputs)
    return out.reshape(B, V, V)


# ---------------- pure-JAX reference (mirrors the PyTorch forward, eval-mode BN) -----
def scorenet_reference(feats, params):
    f = feats[:, 1:]
    f = f.reshape(B, V, 2, D).mean(axis=2)                      # (B, V, D)
    x = jnp.transpose(f, (0, 2, 1))[:, :, :, None]              # (B, D, V, 1)
    x = jnp.broadcast_to(x, (B, D, V, V))
    t = jnp.transpose(x, (0, 1, 3, 2))
    x = jnp.concatenate([x, t], axis=1)                         # (B, 2D, V, V)

    def conv1x1(x, w, b):                                       # w: (cin, cout)
        return jnp.einsum('bchw,co->bohw', x, w) + b[None, :, None, None]

    def bn(x, p):
        inv = p['gamma'] / jnp.sqrt(p['var'] + BN_EPS)
        return ((x - p['mean'][None, :, None, None]) * inv[None, :, None, None]
                + p['beta'][None, :, None, None])

    x = jnp.maximum(bn(conv1x1(x, params['w1'], params['b1']), params['bn1']), 0.0)
    x = jnp.maximum(bn(conv1x1(x, params['w2'], params['b2']), params['bn2']), 0.0)
    x = jnp.maximum(bn(conv1x1(x, params['w3'], params['b3']), params['bn3']), 0.0)
    x = conv1x1(x, params['w4'], params['b4'])
    return x[:, 0]


if __name__ == "__main__":
    key = jax.random.PRNGKey(0)
    kf, kp = jax.random.split(key)
    feats = jax.random.normal(kf, (B, S, D), jnp.float32)       # (2, 17, 32)
    params = init_params(kp)

    out = jax.jit(scorenet_forward)(feats, params)
    out = jax.block_until_ready(out)
    assert out.shape == (B, V, V), out.shape
    assert bool(jnp.all(jnp.isfinite(out)))

    ref = scorenet_reference(feats, params)
    err = float(jnp.max(jnp.abs(out - ref)))
    # loose tolerance: conv matmuls use bf16 operands (f32 accumulation)
    assert err < 0.2, f"max abs error vs reference: {err}"

    print("KERNEL_OK")
</pallas_src>

<mosaic_0001>
module attributes {stable_mosaic.version = 11 : i64} {
  func.func @scorenet_kernel(%arg0: memref<34x32xf32, #tpu.memory_space<vmem>>, %arg1: memref<16x34xf32, #tpu.memory_space<vmem>>, %arg2: memref<256x16xf32, #tpu.memory_space<vmem>>, %arg3: memref<64x256xbf16, #tpu.memory_space<vmem>>, %arg4: memref<256x128xbf16, #tpu.memory_space<vmem>>, %arg5: memref<128x64xbf16, #tpu.memory_space<vmem>>, %arg6: memref<1x64xbf16, #tpu.memory_space<vmem>>, %arg7: memref<4x256xf32, #tpu.memory_space<vmem>>, %arg8: memref<1x128xf32, #tpu.memory_space<vmem>>) attributes {dimension_semantics = [], scalar_prefetch = 0 : i64, scratch_operands = 0 : i64, tpu.core_type = #tpu.core_type<tc>} {
    %c0 = arith.constant 0 : index
    %c0_0 = arith.constant 0 : index
    %0 = vector.load %arg7[%c0, %c0_0] : memref<4x256xf32, #tpu.memory_space<vmem>>, vector<4x256xf32>
    %c0_1 = arith.constant 0 : index
    %c0_2 = arith.constant 0 : index
    %1 = vector.load %arg1[%c0_1, %c0_2] : memref<16x34xf32, #tpu.memory_space<vmem>>, vector<16x34xf32>
    %c0_3 = arith.constant 0 : index
    %c0_4 = arith.constant 0 : index
    %2 = vector.load %arg0[%c0_3, %c0_4] : memref<34x32xf32, #tpu.memory_space<vmem>>, vector<34x32xf32>
    %cst = arith.constant dense<0.000000e+00> : vector<16x32xf32>
    %3 = tpu.matmul %1, %2, %cst {dimension_numbers = #tpu.dot_dimension_numbers<[1], [0], [0], [1], [0, 0, 1, 1], [], []>} : vector<16x34xf32>, vector<34x32xf32>, vector<16x32xf32> -> vector<16x32xf32>
    %4 = arith.truncf %3 : vector<16x32xf32> to vector<16x32xbf16>
    %c0_5 = arith.constant 0 : index
    %c0_6 = arith.constant 0 : index
    %5 = vector.load %arg3[%c0_5, %c0_6] : memref<64x256xbf16, #tpu.memory_space<vmem>>, vector<64x256xbf16>
    %6 = vector.extract_strided_slice %5 {offsets = [0, 0], sizes = [32, 256], strides = [1, 1]} : vector<64x256xbf16> to vector<32x256xbf16>
    %cst_7 = arith.constant dense<0.000000e+00> : vector<16x256xf32>
    %7 = tpu.matmul %4, %6, %cst_7 {dimension_numbers = #tpu.dot_dimension_numbers<[1], [0], [0], [1], [0, 0, 1, 1], [], []>} : vector<16x32xbf16>, vector<32x256xbf16>, vector<16x256xf32> -> vector<16x256xf32>
    %8 = vector.extract_strided_slice %0 {offsets = [0, 0], sizes = [1, 256], strides = [1, 1]} : vector<4x256xf32> to vector<1x256xf32>
    %9 = vector.broadcast %8 : vector<1x256xf32> to vector<16x256xf32>
    %10 = arith.addf %7, %9 : vector<16x256xf32>
    %11 = vector.extract_strided_slice %5 {offsets = [32, 0], sizes = [32, 256], strides = [1, 1]} : vector<64x256xbf16> to vector<32x256xbf16>
    %cst_8 = arith.constant dense<0.000000e+00> : vector<16x256xf32>
    %12 = tpu.matmul %4, %11, %cst_8 {dimension_numbers = #tpu.dot_dimension_numbers<[1], [0], [0], [1], [0, 0, 1, 1], [], []>} : vector<16x32xbf16>, vector<32x256xbf16>, vector<16x256xf32> -> vector<16x256xf32>
    %c0_9 = arith.constant 0 : index
    %c0_10 = arith.constant 0 : index
    %13 = vector.load %arg2[%c0_9, %c0_10] : memref<256x16xf32, #tpu.memory_space<vmem>>, vector<256x16xf32>
    %14 = vector.extract_strided_slice %13 {offsets = [0, 0], sizes = [128, 16], strides = [1, 1]} : vector<256x16xf32> to vector<128x16xf32>
    %cst_11 = arith.constant dense<0.000000e+00> : vector<128x256xf32>
    %15 = tpu.matmul %14, %10, %cst_11 {dimension_numbers = #tpu.dot_dimension_numbers<[1], [0], [0], [1], [0, 0, 1, 1], [], []>} : vector<128x16xf32>, vector<16x256xf32>, vector<128x256xf32> -> vector<128x256xf32>
    %16 = vector.extract_strided_slice %13 {offsets = [128, 0], sizes = [128, 16], strides = [1, 1]} : vector<256x16xf32> to vector<128x16xf32>
    %cst_12 = arith.constant dense<0.000000e+00> : vector<128x256xf32>
    %17 = tpu.matmul %16, %12, %cst_12 {dimension_numbers = #tpu.dot_dimension_numbers<[1], [0], [0], [1], [0, 0, 1, 1], [], []>} : vector<128x16xf32>, vector<16x256xf32>, vector<128x256xf32> -> vector<128x256xf32>
    %18 = arith.addf %15, %17 : vector<128x256xf32>
    %cst_13 = arith.constant 0.000000e+00 : f32
    %19 = vector.broadcast %cst_13 : f32 to vector<128x256xf32>
    %20 = arith.maximumf %18, %19 : vector<128x256xf32>
    %21 = arith.truncf %20 : vector<128x256xf32> to vector<128x256xbf16>
    %c0_14 = arith.constant 0 : index
    %c0_15 = arith.constant 0 : index
    %22 = vector.load %arg4[%c0_14, %c0_15] : memref<256x128xbf16, #tpu.memory_space<vmem>>, vector<256x128xbf16>
    %cst_16 = arith.constant dense<0.000000e+00> : vector<128x128xf32>
    %23 = tpu.matmul %21, %22, %cst_16 {dimension_numbers = #tpu.dot_dimension_numbers<[1], [0], [0], [1], [0, 0, 1, 1], [], []>} : vector<128x256xbf16>, vector<256x128xbf16>, vector<128x128xf32> -> vector<128x128xf32>
    %24 = vector.extract_strided_slice %0 {offsets = [1, 0], sizes = [1, 128], strides = [1, 1]} : vector<4x256xf32> to vector<1x128xf32>
    %25 = vector.broadcast %24 : vector<1x128xf32> to vector<128x128xf32>
    %26 = arith.addf %23, %25 : vector<128x128xf32>
    %cst_17 = arith.constant 0.000000e+00 : f32
    %27 = vector.broadcast %cst_17 : f32 to vector<128x128xf32>
    %28 = arith.maximumf %26, %27 : vector<128x128xf32>
    %29 = arith.truncf %28 : vector<128x128xf32> to vector<128x128xbf16>
    %c0_18 = arith.constant 0 : index
    %c0_19 = arith.constant 0 : index
    %30 = vector.load %arg5[%c0_18, %c0_19] : memref<128x64xbf16, #tpu.memory_space<vmem>>, vector<128x64xbf16>
    %cst_20 = arith.constant dense<0.000000e+00> : vector<128x64xf32>
    %31 = tpu.matmul %29, %30, %cst_20 {dimension_numbers = #tpu.dot_dimension_numbers<[1], [0], [0], [1], [0, 0, 1, 1], [], []>} : vector<128x128xbf16>, vector<128x64xbf16>, vector<128x64xf32> -> vector<128x64xf32>
    %32 = vector.extract_strided_slice %0 {offsets = [2, 0], sizes = [1, 64], strides = [1, 1]} : vector<4x256xf32> to vector<1x64xf32>
    %33 = vector.broadcast %32 : vector<1x64xf32> to vector<128x64xf32>
    %34 = arith.addf %31, %33 : vector<128x64xf32>
    %cst_21 = arith.constant 0.000000e+00 : f32
    %35 = vector.broadcast %cst_21 : f32 to vector<128x64xf32>
    %36 = arith.maximumf %34, %35 : vector<128x64xf32>
    %c0_22 = arith.constant 0 : index
    %c0_23 = arith.constant 0 : index
    %37 = vector.load %arg6[%c0_22, %c0_23] : memref<1x64xbf16, #tpu.memory_space<vmem>>, vector<1x64xbf16>
    %38 = arith.truncf %36 : vector<128x64xf32> to vector<128x64xbf16>
    %cst_24 = arith.constant dense<0.000000e+00> : vector<1x128xf32>
    %39 = tpu.matmul %37, %38, %cst_24 {dimension_numbers = #tpu.dot_dimension_numbers<[1], [1], [0], [0], [0, 0, 1, 0], [], []>} : vector<1x64xbf16>, vector<128x64xbf16>, vector<1x128xf32> -> vector<1x128xf32>
    %40 = vector.extract_strided_slice %0 {offsets = [3, 0], sizes = [1, 1], strides = [1, 1]} : vector<4x256xf32> to vector<1x1xf32>
    %41 = vector.broadcast %40 : vector<1x1xf32> to vector<1x128xf32>
    %42 = arith.addf %39, %41 : vector<1x128xf32>
    %c0_25 = arith.constant 0 : index
    %c0_26 = arith.constant 0 : index
    %43 = vector.load %arg8[%c0_25, %c0_26] : memref<1x128xf32, #tpu.memory_space<vmem>>, vector<1x128xf32>
    tpu.vector_store %arg8[%c0_25, %c0_26], %42 {strides = array<i32>} : memref<1x128xf32, #tpu.memory_space<vmem>>, vector<1x128xf32>,
    return
  }
}

</mosaic_0001>

<bundles_post_ra>
// kernel: scorenet_forward.1
= control target key start
LH: loop header
LB: loop body
LE: loop exit
PB: predicated region body
PF: predicated region fallthrough
CT: control target
= control target key end

     0   :  { %vm38_vm0 = vcmask 277504   ;;  %vm45_vm1 = vcmask 1041408   ;;  %v1634_v14 = vmov 0   ;;  %vm172_vm2 = vcmask 261120   ;;  %s2040_s0 = inlined_call_operand.vmem [shape: f32[34,32], index: 0, kind: input, shape index: {}]   ;;  %s2041_s1 = inlined_call_operand.vmem [shape: f32[16,34], index: 1, kind: input, shape index: {}]   ;;  %s2042_s3 = inlined_call_operand.vmem [shape: bf16[64,256], index: 3, kind: input, shape index: {}]   ;;  %s2043_s7 = inlined_call_operand.vmem [shape: f32[4,256], index: 7, kind: input, shape index: {}]   ;;  %s2044_s2 = inlined_call_operand.vmem [shape: f32[256,16], index: 2, kind: input, shape index: {}]   ;;  %s2045_s4 = inlined_call_operand.vmem [shape: bf16[256,128], index: 4, kind: input, shape index: {}]   ;;  %s2046_s5 = inlined_call_operand.vmem [shape: bf16[128,64], index: 5, kind: input, shape index: {}]   ;;  %s2047_s6 = inlined_call_operand.vmem [shape: bf16[1,64], index: 6, kind: input, shape index: {}]   ;;  %s2048_s8 = inlined_call_operand.vmem [shape: f32[1,128], index: 8, kind: output, shape index: {}]  }
   0x1   :  { %v33_v0 = vld [vmem:[%s2040_s0] sm:$0xff]  ;;  %v34_v1 = vld [vmem:[%s2040_s0 + $0x8] sm:$0xff]  ;;  %v35_v2 = vld [vmem:[%s2040_s0 + $0x10] sm:$0xff]  ;;  %208 = vmatprep.mubr.bf16.mxu1 %v1634_v14  ;;  %1597 = vset.pattern.permute.xlu0 %v1634_v14  ;;  %v1635_v22 = vmov 0.0   ;;  %v134_v23 = vlaneseq  ;;  %vm314_vm3 = vcmask 130048   ;;  %vm1636_vm4 = vmmov 0  }
   0x2   :  { %v1545_v3 = vpack.c.bf16 %v34_v1, %v33_v0  ;;  %v36_v4 = vld [vmem:[%s2040_s0 + $0x18] sm:$0xff]  ;;  %v31_v5 = vld [vmem:[%s2041_s1] sm:$0xff]  ;;  %v32_v10 = vld [vmem:[%s2041_s1 + $0x8] sm:$0xff]  ;;  %vm1241_vm5 = vcmask 523264  }
   0x3   :  { %v1549_v6 = vpack.c.bf16 %v36_v4, %v35_v2  ;;  %1490 = vmatprep.mubr.msk.f32.mxu0 %vm38_vm0, %v31_v5  ;;  %v1598_v7 = vld [vmem:[%s2042_s3 + $0x4] ss:$8 sps:$4 sm:$0xff]   ;;  %v1600_v8 = vld [vmem:[%s2042_s3] ss:$8 sps:$4 sm:$0xff]   ;;  %v1601_v11 = vld [vmem:[%s2042_s3 + $0x14] ss:$8 sps:$4 sm:$0xff]  }
   0x4   :  { %1546 = vmatprep.subr.bf16.mxu0 %v1545_v3  ;;  %176 = vmatprep.subr.bf16.mxu1 %v1598_v7  ;;  %v37_v9 = vld [vmem:[%s2040_s0 + $0x20] sm:$0x3]  ;;  %v1603_v12 = vld [vmem:[%s2042_s3 + $0x10] ss:$8 sps:$4 sm:$0xff]   ;;  %v1606_v13 = vld [vmem:[%s2042_s3 + $0x24] ss:$8 sps:$4 sm:$0xff]  }
   0x5   :  { %1548 = vmatpush3.bf16.msra.mxu0 %v1545_v3  ;;  %177 = vmatpush1.bf16.msra.mxu1 %v1600_v8  ;;  %v1724_v15 = vld [vmem:[%s2043_s7] sm:$0xff]  ;;  %v1609_v20 = vld [vmem:[%s2042_s3 + $0x34] ss:$8 sps:$4 sm:$0xff]   ;;  %v1607_v21 = vld [vmem:[%s2042_s3 + $0x30] ss:$8 sps:$4 sm:$0xff]   ;;  %v1737_v24 = vshrl.u32 %v134_v23, 7 }
   0x6   :  { %1550 = vmatprep.subr.bf16.mxu0 %v1549_v6  ;;  %178 = vmatprep.subr.bf16.mxu1 %v1601_v11  ;;  %v1604_v18 = vld [vmem:[%s2042_s3 + $0x20] ss:$8 sps:$4 sm:$0xff]   ;;  %v1614_v53 = vld [vmem:[%s2045_s4 + $0x50] sm:$0xff]   ;;  %v1616_v56 = vld [vmem:[%s2045_s4 + $0x58] sm:$0xff]  }
   0x7   :  { %1225 = vperm.xlu0 %1597, %v1724_v15   ;;  %v136_v25 = vsub.s32 0, %v1737_v24  ;;  %v140_v26 = vsub.s32 4, %v1737_v24  ;;  %v298_v47 = vld [vmem:[%s2044_s2 + $0x80] sm:$0xff]  ;;  %v299_v50 = vld [vmem:[%s2044_s2 + $0x88] sm:$0xff]  ;;  %v300_v54 = vld [vmem:[%s2044_s2 + $0x90] sm:$0xff] }
   0x8   :  { %v1610_v48 = vld [vmem:[%s2045_s4 + $0x40] sm:$0xff]   ;;  %v1612_v51 = vld [vmem:[%s2045_s4 + $0x48] sm:$0xff]   ;;  %v1615_v55 = vld [vmem:[%s2045_s4 + $0x10] sm:$0xff]  }
   0x9   :  { %1552 = vmatpush3.bf16.msra.mxu0 %v1549_v6  ;;  %179 = vmatpush1.bf16.msra.mxu1 %v1603_v12  ;;  %v137_v27 = vrot.slane %v1724_v15, %v136_v25  ;;  %v141_v28 = vrot.slane %v1724_v15, %v140_v26  ;;  %v1611_v49 = vld [vmem:[%s2045_s4] sm:$0xff]   ;;  %v1613_v52 = vld [vmem:[%s2045_s4 + $0x8] sm:$0xff]   ;;  %v1617_v57 = vld [vmem:[%s2045_s4 + $0x18] sm:$0xff]  }
   0xa   :  { %1488 = vmatprep.subr.msk.mxu0 %vm45_vm1, %v37_v9  ;;  %239 = vmatprep.subr.bf16.mxu1 %v1606_v13  ;;  %v301_v58 = vld [vmem:[%s2044_s2 + $0x98] sm:$0xff]  ;;  %v1618_v59 = vld [vmem:[%s2045_s4 + $0x60] sm:$0xff]   ;;  %v1620_v62 = vld [vmem:[%s2045_s4 + $0x68] sm:$0xff]  }
   0xb   :  { %v147_v29 = vrot.slane %v137_v27, %v136_v25  ;;  %v151_v31 = vrot.slane %v141_v28, %v136_v25  ;;  %v1619_v60 = vld [vmem:[%s2045_s4 + $0x20] sm:$0xff]   ;;  %v303_v63 = vld [vmem:[%s2044_s2 + $0xa8] sm:$0xff]  ;;  %v304_v0 = vld [vmem:[%s2044_s2 + $0xb0] sm:$0xff] }
   0xc   :  { %v302_v61 = vld [vmem:[%s2044_s2 + $0xa0] sm:$0xff]  ;;  %v305_v1 = vld [vmem:[%s2044_s2 + $0xb8] sm:$0xff]  ;;  %v307_v3 = vld [vmem:[%s2044_s2 + $0xc8] sm:$0xff] }
   0xd   :  { %1489 = vmatpush3.msk.msra.mxu0 %vm45_vm1, %v37_v9  ;;  %v306_v2 = vld [vmem:[%s2044_s2 + $0xc0] sm:$0xff]  ;;  %v308_v4 = vld [vmem:[%s2044_s2 + $0xd0] sm:$0xff]  ;;  %v309_v5 = vld [vmem:[%s2044_s2 + $0xd8] sm:$0xff] }
   0xe   :  { %1491 = vmatmul.mubr.msk.f32.vlgmr.msra.gmra.mrb[0].mxu0 %vm38_vm0, %v32_v10  ;;  %v310_v6 = vld [vmem:[%s2044_s2 + $0xe0] sm:$0xff]  ;;  %v311_v7 = vld [vmem:[%s2044_s2 + $0xe8] sm:$0xff]  ;;  %v312_v8 = vld [vmem:[%s2044_s2 + $0xf0] sm:$0xff] }
   0xf   :  { %427 = vmatprep.mubr.f32.mxu0 %v1635_v22  ;;  %v313_v9 = vld [vmem:[%s2044_s2 + $0xf8] sm:$0xff]  ;;  %v282_v10 = vld [vmem:[%s2044_s2] sm:$0xff]  ;;  %v283_v11 = vld [vmem:[%s2044_s2 + $0x8] sm:$0xff] }
  0x10   :  { %v284_v12 = vld [vmem:[%s2044_s2 + $0x10] sm:$0xff]  ;;  %v285_v13 = vld [vmem:[%s2044_s2 + $0x18] sm:$0xff]  ;;  %v294_v25 = vld [vmem:[%s2044_s2 + $0x60] sm:$0xff] }
  0x11   :  { %v293_v23 = vld [vmem:[%s2044_s2 + $0x58] sm:$0xff]  ;;  %v295_v26 = vld [vmem:[%s2044_s2 + $0x68] sm:$0xff]  ;;  %v296_v27 = vld [vmem:[%s2044_s2 + $0x70] sm:$0xff] }
  0x12   :  { %v297_v28 = vld [vmem:[%s2044_s2 + $0x78] sm:$0xff] }
  0xe1   :  { %v1492_v16 = vpop.f32.mrb[0].mxu0 }
  0xe2   :  { %v115_v17 = vpop.f32.mrb[1].mxu0 }
  0xe3   :  { %v124_v19 = vpack.c.bf16 %v1492_v16, %v115_v17  ;;  %v287_v16 = vld [vmem:[%s2044_s2 + $0x28] sm:$0xff]  ;;  %v288_v17 = vld [vmem:[%s2044_s2 + $0x30] sm:$0xff] }
  0xe5   :  { %1321 = vmatmul.mubr.msk.bf16.vlgmr.msra.gmra.mrb[0].mxu1 %vm172_vm2, %v124_v19 }
  0xe6   :  { %240 = vmatpush1.bf16.msra.mxu1 %v1604_v18  ;;  %271 = vmatprep.mubr.bf16.mxu1 %v1634_v14  ;;  %v286_v14 = vld [vmem:[%s2044_s2 + $0x20] sm:$0xff]  ;;  %v289_v18 = vld [vmem:[%s2044_s2 + $0x38] sm:$0xff] }
  0xe7   :  { %241 = vmatprep.subr.bf16.mxu1 %v1609_v20  ;;  %v291_v20 = vld [vmem:[%s2044_s2 + $0x48] sm:$0xff] }
  0xea   :  { %242 = vmatpush1.bf16.msra.mxu1 %v1607_v21  ;;  %v292_v21 = vld [vmem:[%s2044_s2 + $0x50] sm:$0xff] }
  0xeb   :  { %1391 = vmatprep.subr.bf16.mxu1 %v1610_v48 }
  0xed   :  { %1326 = vmatmul.mubr.msk.bf16.vlgmr.msra.gmra.mrb[4].mxu1 %vm172_vm2, %v124_v19  ;;  %v290_v19 = vld [vmem:[%s2044_s2 + $0x40] sm:$0xff] }
  0xee   :  { %1392 = vmatpush3.bf16.msra.mxu1 %v1611_v49 }
  0xef   :  { %1393 = vmatprep.subr.bf16.mxu1 %v1612_v51 }
  0xf2   :  { %1394 = vmatpush3.bf16.msra.mxu1 %v1613_v52  ;;  %v1628_v52 = vld [vmem:[%s2046_s5 + $0x10] sm:$0xff]  }
  0xf3   :  { %1395 = vmatprep.subr.bf16.mxu1 %v1614_v53 }
  0xf6   :  { %1396 = vmatpush3.bf16.msra.mxu1 %v1615_v55 }
  0xf7   :  { %1397 = vmatprep.subr.bf16.mxu1 %v1616_v56 }
  0xfa   :  { %1398 = vmatpush3.bf16.msra.mxu1 %v1617_v57 }
  0xfb   :  { %1399 = vmatprep.subr.bf16.mxu1 %v1618_v59  ;;  %v1629_v59 = vld [vmem:[%s2046_s5 + $0x18] sm:$0xff]  }
  0xfe   :  { %1400 = vmatpush3.bf16.msra.mxu1 %v1619_v60 }
  0xff   :  { %1401 = vmatprep.subr.bf16.mxu1 %v1620_v62 }
 0x1b8   :  { %v210_v30 = vpop.f32.mrb[0].mxu1 }
 0x1b9   :  { %v212_v32 = vpop.f32.mrb[1].mxu1  ;;  %v211_v34 = vadd.f32 %v210_v30, %v147_v29  ;;  %v1622_v30 = vld [vmem:[%s2045_s4 + $0x70] sm:$0xff]  }
 0x1ba   :  { %v214_v33 = vpop.f32.mrb[2].mxu1  ;;  %v213_v37 = vadd.f32 %v212_v32, %v151_v31  ;;  %v1624_v32 = vld [vmem:[%s2045_s4 + $0x78] sm:$0xff]  }
 0x1bb   :  { %v215_v35 = vadd.f32 %v214_v33, %v147_v29  ;;  %v216_v36 = vpop.f32.mrb[3].mxu1  ;;  %v1621_v29 = vld [vmem:[%s2045_s4 + $0x28] sm:$0xff]   ;;  %v1625_v33 = vld [vmem:[%s2045_s4 + $0x38] sm:$0xff]  }
 0x1bc   :  { %v217_v38 = vadd.f32 %v216_v36, %v151_v31  ;;  %1402 = vmatpush3.bf16.msra.mxu1 %v1621_v29  ;;  %v1623_v31 = vld [vmem:[%s2045_s4 + $0x30] sm:$0xff]  }
 0x1bd   :  { %v1559_v39 = vpack.c.bf16 %v215_v35, %v211_v34  ;;  %1403 = vmatprep.subr.bf16.mxu1 %v1622_v30  ;;  %v1626_v34 = vld [vmem:[%s2046_s5] sm:$0xff]  }
 0x1be   :  { %v1557_v40 = vpack.c.bf16 %v217_v38, %v213_v37 }
 0x1c0   :  { %v273_v41 = vpop.f32.mrb[4].mxu1  ;;  %1404 = vmatpush3.bf16.msra.mxu1 %v1623_v31 }
 0x1c1   :  { %v275_v42 = vpop.f32.mrb[5].mxu1  ;;  %1405 = vmatprep.subr.bf16.mxu1 %v1624_v32 }
 0x1c2   :  { %v277_v43 = vpop.f32.mrb[6].mxu1 }
 0x1c3   :  { %v1555_v44 = vpack.c.bf16 %v277_v43, %v273_v41  ;;  %v279_v45 = vpop.f32.mrb[7].mxu1 }
 0x1c4   :  { %v1553_v46 = vpack.c.bf16 %v279_v45, %v275_v42  ;;  %1406 = vmatpush3.bf16.msra.mxu1 %v1625_v33 }
 0x1c5   :  { %1493 = vmatprep.subr.bf16.mxu1 %v1626_v34 }
 0x1c6   :  { %1554 = vmatprep.subr.bf16.mxu0 %v1553_v46 }
 0x1c7   :  { %1556 = vmatpush1.bf16.msra.mxu0 %v1555_v44 }
 0x1c8   :  { %1558 = vmatprep.subr.bf16.mxu0 %v1557_v40 }
 0x1ca   :  { %1327 = vmatmul.mubr.msk.f32.vlgmr.msra.gmra.mrb[2].mxu0 %vm314_vm3, %v298_v47  ;;  %v1627_v47 = vld [vmem:[%s2046_s5 + $0x8] sm:$0xff]  }
 0x1cb   :  { %1560 = vmatpush1.bf16.msra.mxu0 %v1559_v39  ;;  %433 = vmatprep.mubr.f32.mxu0 %v1635_v22 }
 0x1cc   :  { %1525 = vmatprep.subr.bf16.mxu0 %v1635_v22 }
 0x1ce   :  { %1328 = vmatmul.mubr.msk.f32.gmra.mrb[4].mxu0 %vm314_vm3, %v299_v50 }
 0x1cf   :  { %439 = vmatprep.mubr.f32.mxu0 %v1635_v22 }
 0x1d2   :  { %1329 = vmatmul.mubr.msk.f32.gmra.mrb[6].mxu0 %vm314_vm3, %v300_v54 }
 0x1d3   :  { %445 = vmatprep.mubr.f32.mxu0 %v1635_v22 }
 0x1d6   :  { %1330 = vmatmul.mubr.msk.f32.gmra.mrb[8].mxu0 %vm314_vm3, %v301_v58 }
 0x1d7   :  { %451 = vmatprep.mubr.f32.mxu0 %v1635_v22 }
 0x1da   :  { %1331 = vmatmul.mubr.msk.f32.gmra.mrb[10].mxu0 %vm314_vm3, %v302_v61 }
 0x1db   :  { %457 = vmatprep.mubr.f32.mxu0 %v1635_v22 }
 0x1de   :  { %1332 = vmatmul.mubr.msk.f32.gmra.mrb[12].mxu0 %vm314_vm3, %v303_v63 }
 0x1df   :  { %463 = vmatprep.mubr.f32.mxu0 %v1635_v22 }
 0x1e2   :  { %1333 = vmatmul.mubr.msk.f32.gmra.mrb[14].mxu0 %vm314_vm3, %v304_v0  ;;  %v1630_v0 = vld [vmem:[%s2046_s5 + $0x20] sm:$0xff]  }
 0x1e3   :  { %469 = vmatprep.mubr.f32.mxu0 %v1635_v22 }
 0x1e6   :  { %1334 = vmatmul.mubr.msk.f32.gmra.mrb[16].mxu0 %vm314_vm3, %v305_v1 }
 0x1e7   :  { %475 = vmatprep.mubr.f32.mxu0 %v1635_v22 }
 0x1ea   :  { %1335 = vmatmul.mubr.msk.f32.gmra.mrb[18].mxu0 %vm314_vm3, %v306_v2 }
 0x1eb   :  { %481 = vmatprep.mubr.f32.mxu0 %v1635_v22 }
 0x1ee   :  { %1336 = vmatmul.mubr.msk.f32.gmra.mrb[20].mxu0 %vm314_vm3, %v307_v3 }
 0x1ef   :  { %487 = vmatprep.mubr.f32.mxu0 %v1635_v22 }
 0x1f2   :  { %1337 = vmatmul.mubr.msk.f32.gmra.mrb[22].mxu0 %vm314_vm3, %v308_v4 }
 0x1f3   :  { %493 = vmatprep.mubr.f32.mxu0 %v1635_v22 }
 0x1f6   :  { %1338 = vmatmul.mubr.msk.f32.gmra.mrb[24].mxu0 %vm314_vm3, %v309_v5 }
 0x1f7   :  { %499 = vmatprep.mubr.f32.mxu0 %v1635_v22 }
 0x1fa   :  { %1339 = vmatmul.mubr.msk.f32.gmra.mrb[26].mxu0 %vm314_vm3, %v310_v6 }
 0x1fb   :  { %505 = vmatprep.mubr.f32.mxu0 %v1635_v22 }
 0x1fe   :  { %1340 = vmatmul.mubr.msk.f32.gmra.mrb[28].mxu0 %vm314_vm3, %v311_v7  ;;  %v1631_v7 = vld [vmem:[%s2046_s5 + $0x28] sm:$0xff]  }
 0x1ff   :  { %511 = vmatprep.mubr.f32.mxu0 %v1635_v22 }
 0x202   :  { %1341 = vmatmul.mubr.msk.f32.gmra.mrb[30].mxu0 %vm314_vm3, %v312_v8 }
 0x203   :  { %517 = vmatprep.mubr.f32.mxu0 %v1635_v22 }
 0x206   :  { %1342 = vmatmul.mubr.msk.f32.gmra.mrb[32].mxu0 %vm314_vm3, %v313_v9 }
 0x207   :  { %636 = vmatprep.mubr.f32.mxu0 %v1635_v22 }
 0x20a   :  { %1343 = vmatmul.mubr.msk.f32.vlgmr.msra.gmra.mrb[2].mxu0 %vm314_vm3, %v282_v10 }
 0x20b   :  { %642 = vmatprep.mubr.f32.mxu0 %v1635_v22 }
 0x20e   :  { %1344 = vmatmul.mubr.msk.f32.gmra.mrb[4].mxu0 %vm314_vm3, %v283_v11 }
 0x20f   :  { %648 = vmatprep.mubr.f32.mxu0 %v1635_v22 }
 0x212   :  { %1345 = vmatmul.mubr.msk.f32.gmra.mrb[6].mxu0 %vm314_vm3, %v284_v12 }
 0x213   :  { %654 = vmatprep.mubr.f32.mxu0 %v1635_v22 }
 0x216   :  { %1346 = vmatmul.mubr.msk.f32.gmra.mrb[8].mxu0 %vm314_vm3, %v285_v13 }
 0x217   :  { %660 = vmatprep.mubr.f32.mxu0 %v1635_v22 }
 0x21a   :  { %1347 = vmatmul.mubr.msk.f32.gmra.mrb[10].mxu0 %vm314_vm3, %v286_v14 }
 0x21b   :  { %666 = vmatprep.mubr.f32.mxu0 %v1635_v22 }
 0x21e   :  { %1348 = vmatmul.mubr.msk.f32.gmra.mrb[12].mxu0 %vm314_vm3, %v287_v16 }
 0x21f   :  { %672 = vmatprep.mubr.f32.mxu0 %v1635_v22 }
 0x222   :  { %1349 = vmatmul.mubr.msk.f32.gmra.mrb[14].mxu0 %vm314_vm3, %v288_v17 }
 0x223   :  { %678 = vmatprep.mubr.f32.mxu0 %v1635_v22 }
 0x226   :  { %1350 = vmatmul.mubr.msk.f32.gmra.mrb[16].mxu0 %vm314_vm3, %v289_v18 }
 0x227   :  { %684 = vmatprep.mubr.f32.mxu0 %v1635_v22 }
 0x22a   :  { %1351 = vmatmul.mubr.msk.f32.gmra.mrb[18].mxu0 %vm314_vm3, %v290_v19 }
 0x22b   :  { %690 = vmatprep.mubr.f32.mxu0 %v1635_v22 }
 0x22e   :  { %1352 = vmatmul.mubr.msk.f32.gmra.mrb[20].mxu0 %vm314_vm3, %v291_v20 }
 0x22f   :  { %696 = vmatprep.mubr.f32.mxu0 %v1635_v22 }
 0x232   :  { %1353 = vmatmul.mubr.msk.f32.gmra.mrb[22].mxu0 %vm314_vm3, %v292_v21 }
 0x233   :  { %702 = vmatprep.mubr.f32.mxu0 %v1635_v22 }
 0x236   :  { %1354 = vmatmul.mubr.msk.f32.gmra.mrb[24].mxu0 %vm314_vm3, %v293_v23 }
 0x237   :  { %708 = vmatprep.mubr.f32.mxu0 %v1635_v22 }
 0x23a   :  { %1355 = vmatmul.mubr.msk.f32.gmra.mrb[26].mxu0 %vm314_vm3, %v294_v25 }
 0x23b   :  { %714 = vmatprep.mubr.f32.mxu0 %v1635_v22 }
 0x23e   :  { %1356 = vmatmul.mubr.msk.f32.gmra.mrb[28].mxu0 %vm314_vm3, %v295_v26 }
 0x23f   :  { %720 = vmatprep.mubr.f32.mxu0 %v1635_v22 }
 0x242   :  { %1357 = vmatmul.mubr.msk.f32.gmra.mrb[30].mxu0 %vm314_vm3, %v296_v27 }
 0x243   :  { %726 = vmatprep.mubr.f32.mxu0 %v1635_v22 }
 0x246   :  { %1358 = vmatmul.mubr.msk.f32.gmra.mrb[32].mxu0 %vm314_vm3, %v297_v28 }
 0x247   :  { %1541 = vmatprep.mubr.msk.bf16.mxu0 %vm1636_vm4, %v1635_v22 }
 0x2dd   :  { %v638_v35 = vpop.f32.mrb[2].mxu0 }
 0x2de   :  { %v640_v36 = vpop.f32.mrb[3].mxu0  ;;  %v733_v38 = vmax.f32 %v638_v35, 0.0 }
 0x2df   :  { %v734_v41 = vmax.f32 %v640_v36, 0.0 }
 0x2e1   :  { %v644_v37 = vpop.f32.mrb[4].mxu0 }
 0x2e2   :  { %v735_v39 = vmax.f32 %v644_v37, 0.0  ;;  %v646_v40 = vpop.f32.mrb[5].mxu0 }
 0x2e3   :  { %v736_v42 = vmax.f32 %v646_v40, 0.0 }
 0x2e4   :  { %v765_v43 = vpack.c.bf16 %v735_v39, %v733_v38 }
 0x2e5   :  { %v766_v44 = vpack.c.bf16 %v736_v42, %v734_v41  ;;  %v650_v45 = vpop.f32.mrb[6].mxu0 }
 0x2e6   :  { %v652_v46 = vpop.f32.mrb[7].mxu0  ;;  %v737_v49 = vmax.f32 %v650_v45, 0.0 }
 0x2e7   :  { %945 = vmatprep.mubr.bf16.mxu1 %v766_v44  ;;  %v738_v53 = vmax.f32 %v652_v46, 0.0 }
 0x2e8   :  { %946 = vmatmul.mubr.bf16.vlgmr.msra.gmra.mrb[8].mxu1 %v765_v43 }
 0x2e9   :  { %v656_v48 = vpop.f32.mrb[8].mxu0  ;;  %1494 = vmatpush3.bf16.msra.mxu1 %v1626_v34 }
 0x2ea   :  { %v739_v50 = vmax.f32 %v656_v48, 0.0  ;;  %v658_v51 = vpop.f32.mrb[9].mxu0  ;;  %1495 = vmatprep.subr.bf16.mxu1 %v1627_v47 }
 0x2eb   :  { %v740_v54 = vmax.f32 %v658_v51, 0.0 }
 0x2ec   :  { %v767_v55 = vpack.c.bf16 %v739_v50, %v737_v49 }
 0x2ed   :  { %v768_v56 = vpack.c.bf16 %v740_v54, %v738_v53  ;;  %v662_v57 = vpop.f32.mrb[10].mxu0  ;;  %1496 = vmatpush3.bf16.msra.mxu1 %v1627_v47 }
 0x2ee   :  { %v664_v58 = vpop.f32.mrb[11].mxu0  ;;  %1497 = vmatprep.subr.bf16.mxu1 %v1628_v52  ;;  %v741_v61 = vmax.f32 %v662_v57, 0.0 }
 0x2ef   :  { %953 = vmatprep.mubr.bf16.mxu1 %v768_v56  ;;  %v742_v1 = vmax.f32 %v664_v58, 0.0 }
 0x2f0   :  { %954 = vmatmul.mubr.bf16.gmra.mrb[12].mxu1 %v767_v55 }
 0x2f1   :  { %v668_v60 = vpop.f32.mrb[12].mxu0  ;;  %1498 = vmatpush3.bf16.msra.mxu1 %v1628_v52 }
 0x2f2   :  { %v743_v62 = vmax.f32 %v668_v60, 0.0  ;;  %v670_v63 = vpop.f32.mrb[13].mxu0  ;;  %1499 = vmatprep.subr.bf16.mxu1 %v1629_v59  ;;  %v1633_v60 = vld [vmem:[%s2046_s5 + $0x38] sm:$0xff]  }
 0x2f3   :  { %v744_v2 = vmax.f32 %v670_v63, 0.0 }
 0x2f4   :  { %v769_v3 = vpack.c.bf16 %v743_v62, %v741_v61  ;;  %v815_v61 = vsub.s32 1, %v1737_v24 }
 0x2f5   :  { %v770_v4 = vpack.c.bf16 %v744_v2, %v742_v1  ;;  %v674_v5 = vpop.f32.mrb[14].mxu0  ;;  %1500 = vmatpush3.bf16.msra.mxu1 %v1629_v59  ;;  %v1632_v59 = vld [vmem:[%s2046_s5 + $0x30] sm:$0xff]  }
 0x2f6   :  { %v676_v6 = vpop.f32.mrb[15].mxu0  ;;  %1501 = vmatprep.subr.bf16.mxu1 %v1630_v0  ;;  %v745_v9 = vmax.f32 %v674_v5, 0.0  ;;  %v1977_v62 = vrot.slane %v1724_v15, %v815_v61 }
 0x2f7   :  { %961 = vmatprep.mubr.bf16.mxu1 %v770_v4  ;;  %v746_v12 = vmax.f32 %v676_v6, 0.0 }
 0x2f8   :  { %962 = vmatmul.mubr.bf16.gmra.mrb[16].mxu1 %v769_v3 }
 0x2f9   :  { %v680_v8 = vpop.f32.mrb[16].mxu0  ;;  %1502 = vmatpush3.bf16.msra.mxu1 %v1630_v0 }
 0x2fa   :  { %v747_v10 = vmax.f32 %v680_v8, 0.0  ;;  %v682_v11 = vpop.f32.mrb[17].mxu0  ;;  %1503 = vmatprep.subr.bf16.mxu1 %v1631_v7 }
 0x2fb   :  { %v748_v13 = vmax.f32 %v682_v11, 0.0 }
 0x2fc   :  { %v771_v14 = vpack.c.bf16 %v747_v10, %v745_v9 }
 0x2fd   :  { %v772_v16 = vpack.c.bf16 %v748_v13, %v746_v12  ;;  %v686_v17 = vpop.f32.mrb[18].mxu0  ;;  %1504 = vmatpush3.bf16.msra.mxu1 %v1631_v7 }
 0x2fe   :  { %v688_v18 = vpop.f32.mrb[19].mxu0  ;;  %v749_v20 = vmax.f32 %v686_v17, 0.0  ;;  %1505 = vmatprep.subr.bf16.mxu1 %v1632_v59 }
 0x2ff   :  { %969 = vmatprep.mubr.bf16.mxu1 %v772_v16  ;;  %v750_v25 = vmax.f32 %v688_v18, 0.0 }
 0x300   :  { %970 = vmatmul.mubr.bf16.gmra.mrb[20].mxu1 %v771_v14 }
 0x301   :  { %v692_v19 = vpop.f32.mrb[20].mxu0  ;;  %1506 = vmatpush3.bf16.msra.mxu1 %v1632_v59 }
 0x302   :  { %v751_v21 = vmax.f32 %v692_v19, 0.0  ;;  %v694_v23 = vpop.f32.mrb[21].mxu0  ;;  %1507 = vmatprep.subr.bf16.mxu1 %v1633_v60 }
 0x303   :  { %v752_v26 = vmax.f32 %v694_v23, 0.0 }
 0x304   :  { %v773_v27 = vpack.c.bf16 %v751_v21, %v749_v20 }
 0x305   :  { %v774_v28 = vpack.c.bf16 %v752_v26, %v750_v25  ;;  %v698_v29 = vpop.f32.mrb[22].mxu0  ;;  %1508 = vmatpush3.bf16.msra.mxu1 %v1633_v60 }
 0x306   :  { %v700_v30 = vpop.f32.mrb[23].mxu0  ;;  %v753_v32 = vmax.f32 %v698_v29, 0.0 }
 0x307   :  { %977 = vmatprep.mubr.bf16.mxu1 %v774_v28  ;;  %v754_v35 = vmax.f32 %v700_v30, 0.0 }
 0x308   :  { %978 = vmatmul.mubr.bf16.gmra.mrb[24].mxu1 %v773_v27 }
 0x309   :  { %v704_v31 = vpop.f32.mrb[24].mxu0 }
 0x30a   :  { %v755_v33 = vmax.f32 %v704_v31, 0.0  ;;  %v706_v34 = vpop.f32.mrb[25].mxu0 }
 0x30b   :  { %v756_v36 = vmax.f32 %v706_v34, 0.0 }
 0x30c   :  { %v775_v37 = vpack.c.bf16 %v755_v33, %v753_v32 }
 0x30d   :  { %v776_v38 = vpack.c.bf16 %v756_v36, %v754_v35  ;;  %v710_v39 = vpop.f32.mrb[26].mxu0 }
 0x30e   :  { %v712_v40 = vpop.f32.mrb[27].mxu0  ;;  %v757_v42 = vmax.f32 %v710_v39, 0.0 }
 0x30f   :  { %985 = vmatprep.mubr.bf16.mxu1 %v776_v38  ;;  %v758_v45 = vmax.f32 %v712_v40, 0.0 }
 0x310   :  { %986 = vmatmul.mubr.bf16.gmra.mrb[28].mxu1 %v775_v37 }
 0x311   :  { %v716_v41 = vpop.f32.mrb[28].mxu0 }
 0x312   :  { %v759_v43 = vmax.f32 %v716_v41, 0.0  ;;  %v718_v44 = vpop.f32.mrb[29].mxu0 }
 0x313   :  { %v760_v46 = vmax.f32 %v718_v44, 0.0 }
 0x314   :  { %v777_v47 = vpack.c.bf16 %v759_v43, %v757_v42 }
 0x315   :  { %v778_v48 = vpack.c.bf16 %v760_v46, %v758_v45  ;;  %v722_v49 = vpop.f32.mrb[30].mxu0 }
 0x316   :  { %v724_v50 = vpop.f32.mrb[31].mxu0  ;;  %v761_v52 = vmax.f32 %v722_v49, 0.0 }
 0x317   :  { %993 = vmatprep.mubr.bf16.mxu1 %v778_v48  ;;  %v762_v55 = vmax.f32 %v724_v50, 0.0 }
 0x318   :  { %994 = vmatmul.mubr.bf16.gmra.mrb[32].mxu1 %v777_v47 }
 0x319   :  { %v728_v51 = vpop.f32.mrb[32].mxu0 }
 0x31a   :  { %v763_v53 = vmax.f32 %v728_v51, 0.0  ;;  %v730_v54 = vpop.f32.mrb[33].mxu0 }
 0x31b   :  { %v764_v56 = vmax.f32 %v730_v54, 0.0 }
 0x31c   :  { %v779_v57 = vpack.c.bf16 %v763_v53, %v761_v52 }
 0x31d   :  { %v780_v58 = vpack.c.bf16 %v764_v56, %v762_v55 }
 0x31f   :  { %1001 = vmatprep.mubr.bf16.mxu1 %v780_v58 }
 0x320   :  { %1002 = vmatmul.mubr.bf16.gmra.mrb[36].mxu1 %v779_v57 }
 0x3bb   :  { %v1407_v63 = vpop.f32.mrb[8].mxu1 }
 0x3bc   :  { %v1408_v0 = vpop.f32.mrb[9].mxu1 }
 0x3bd   :  { %v1409_v1 = vadd.f32 %v1408_v0, %v1407_v63  ;;  %v1410_v2 = vpop.f32.mrb[10].mxu1 }
 0x3be   :  { %v1411_v3 = vpop.f32.mrb[11].mxu1 }
 0x3bf   :  { %v948_v4 = vadd.f32 %v1409_v1, %v1977_v62  ;;  %v1412_v5 = vadd.f32 %v1411_v3, %v1410_v2 }
 0x3c1   :  { %v951_v6 = vadd.f32 %v1412_v5, %v1977_v62  ;;  %v1010_v7 = vmax.f32 %v948_v4, 0.0 }
 0x3c3   :  { %v1011_v8 = vmax.f32 %v951_v6, 0.0  ;;  %v1413_v9 = vpop.f32.mrb[12].mxu1 }
 0x3c4   :  { %v1414_v10 = vpop.f32.mrb[13].mxu1 }
 0x3c5   :  { %v1415_v11 = vadd.f32 %v1414_v10, %v1413_v9  ;;  %v1416_v12 = vpop.f32.mrb[14].mxu1  ;;  %v1026_v13 = vpack.c.bf16 %v1011_v8, %v1010_v7 }
 0x3c6   :  { %v1417_v14 = vpop.f32.mrb[15].mxu1 }
 0x3c7   :  { %v956_v16 = vadd.f32 %v1415_v11, %v1977_v62  ;;  %v1418_v17 = vadd.f32 %v1417_v14, %v1416_v12  ;;  %1509 = vmatprep.mubr.bf16.mxu1 %v1026_v13 }
 0x3c9   :  { %v959_v18 = vadd.f32 %v1418_v17, %v1977_v62  ;;  %v1012_v19 = vmax.f32 %v956_v16, 0.0 }
 0x3cb   :  { %v1013_v20 = vmax.f32 %v959_v18, 0.0  ;;  %v1419_v21 = vpop.f32.mrb[16].mxu1 }
 0x3cc   :  { %v1420_v23 = vpop.f32.mrb[17].mxu1 }
 0x3cd   :  { %v1027_v25 = vpack.c.bf16 %v1013_v20, %v1012_v19  ;;  %v1421_v26 = vadd.f32 %v1420_v23, %v1419_v21  ;;  %v1422_v27 = vpop.f32.mrb[18].mxu1 }
 0x3ce   :  { %v1423_v28 = vpop.f32.mrb[19].mxu1 }
 0x3cf   :  { %v964_v29 = vadd.f32 %v1421_v26, %v1977_v62  ;;  %v1424_v30 = vadd.f32 %v1423_v28, %v1422_v27  ;;  %1510 = vmatmul.mubr.bf16.vlgmr.msra.gmra.mrb[40].mxu1 %v1027_v25 }
 0x3d1   :  { %v967_v31 = vadd.f32 %v1424_v30, %v1977_v62  ;;  %v1014_v32 = vmax.f32 %v964_v29, 0.0  ;;  %v1052_v30 = vsub.s32 2, %v1737_v24 }
 0x3d3   :  { %v1015_v33 = vmax.f32 %v967_v31, 0.0  ;;  %v1425_v34 = vpop.f32.mrb[20].mxu1  ;;  %v1998_v31 = vrot.slane %v1724_v15, %v1052_v30 }
 0x3d4   :  { %v1426_v35 = vpop.f32.mrb[21].mxu1 }
 0x3d5   :  { %v1427_v36 = vadd.f32 %v1426_v35, %v1425_v34  ;;  %v1428_v37 = vpop.f32.mrb[22].mxu1  ;;  %v1028_v38 = vpack.c.bf16 %v1015_v33, %v1014_v32 }
 0x3d6   :  { %v1429_v39 = vpop.f32.mrb[23].mxu1 }
 0x3d7   :  { %v972_v40 = vadd.f32 %v1427_v36, %v1977_v62  ;;  %v1430_v41 = vadd.f32 %v1429_v39, %v1428_v37  ;;  %1513 = vmatprep.mubr.bf16.mxu1 %v1028_v38 }
 0x3d9   :  { %v975_v42 = vadd.f32 %v1430_v41, %v1977_v62  ;;  %v1016_v43 = vmax.f32 %v972_v40, 0.0 }
 0x3db   :  { %v1017_v44 = vmax.f32 %v975_v42, 0.0  ;;  %v1431_v45 = vpop.f32.mrb[24].mxu1 }
 0x3dc   :  { %v1432_v46 = vpop.f32.mrb[25].mxu1 }
 0x3dd   :  { %v1433_v47 = vadd.f32 %v1432_v46, %v1431_v45  ;;  %v1434_v48 = vpop.f32.mrb[26].mxu1  ;;  %v1029_v49 = vpack.c.bf16 %v1017_v44, %v1016_v43 }
 0x3de   :  { %v1435_v50 = vpop.f32.mrb[27].mxu1 }
 0x3df   :  { %v980_v51 = vadd.f32 %v1433_v47, %v1977_v62  ;;  %v1436_v52 = vadd.f32 %v1435_v50, %v1434_v48  ;;  %1514 = vmatmul.mubr.bf16.gmra.mrb[44].mxu1 %v1029_v49 }
 0x3e1   :  { %v983_v53 = vadd.f32 %v1436_v52, %v1977_v62  ;;  %v1018_v54 = vmax.f32 %v980_v51, 0.0 }
 0x3e3   :  { %v1019_v55 = vmax.f32 %v983_v53, 0.0  ;;  %v1437_v56 = vpop.f32.mrb[28].mxu1 }
 0x3e4   :  { %v1438_v57 = vpop.f32.mrb[29].mxu1 }
 0x3e5   :  { %v1439_v58 = vadd.f32 %v1438_v57, %v1437_v56  ;;  %v1440_v59 = vpop.f32.mrb[30].mxu1  ;;  %v1030_v60 = vpack.c.bf16 %v1019_v55, %v1018_v54 }
 0x3e6   :  { %v1441_v61 = vpop.f32.mrb[31].mxu1 }
 0x3e7   :  { %v988_v63 = vadd.f32 %v1439_v58, %v1977_v62  ;;  %v1442_v0 = vadd.f32 %v1441_v61, %v1440_v59  ;;  %1517 = vmatprep.mubr.bf16.mxu1 %v1030_v60 }
 0x3e9   :  { %v991_v1 = vadd.f32 %v1442_v0, %v1977_v62  ;;  %v1020_v2 = vmax.f32 %v988_v63, 0.0 }
 0x3eb   :  { %v1021_v3 = vmax.f32 %v991_v1, 0.0  ;;  %v1443_v4 = vpop.f32.mrb[32].mxu1 }
 0x3ec   :  { %v1444_v5 = vpop.f32.mrb[33].mxu1 }
 0x3ed   :  { %v1445_v6 = vadd.f32 %v1444_v5, %v1443_v4  ;;  %v1446_v7 = vpop.f32.mrb[34].mxu1  ;;  %v1031_v8 = vpack.c.bf16 %v1021_v3, %v1020_v2 }
 0x3ee   :  { %v1447_v9 = vpop.f32.mrb[35].mxu1 }
 0x3ef   :  { %v996_v10 = vadd.f32 %v1445_v6, %v1977_v62  ;;  %v1448_v11 = vadd.f32 %v1447_v9, %v1446_v7  ;;  %1518 = vmatmul.mubr.bf16.gmra.mrb[48].mxu1 %v1031_v8 }
 0x3f1   :  { %v999_v12 = vadd.f32 %v1448_v11, %v1977_v62  ;;  %v1022_v13 = vmax.f32 %v996_v10, 0.0 }
 0x3f3   :  { %v1023_v14 = vmax.f32 %v999_v12, 0.0  ;;  %v1449_v16 = vpop.f32.mrb[36].mxu1 }
 0x3f4   :  { %v1450_v17 = vpop.f32.mrb[37].mxu1 }
 0x3f5   :  { %v1451_v18 = vadd.f32 %v1450_v17, %v1449_v16  ;;  %v1452_v19 = vpop.f32.mrb[38].mxu1  ;;  %v1032_v20 = vpack.c.bf16 %v1023_v14, %v1022_v13 }
 0x3f6   :  { %v1453_v21 = vpop.f32.mrb[39].mxu1 }
 0x3f7   :  { %v1004_v23 = vadd.f32 %v1451_v18, %v1977_v62  ;;  %v1454_v25 = vadd.f32 %v1453_v21, %v1452_v19  ;;  %1521 = vmatprep.mubr.bf16.mxu1 %v1032_v20 }
 0x3f9   :  { %v1007_v26 = vadd.f32 %v1454_v25, %v1977_v62  ;;  %v1024_v27 = vmax.f32 %v1004_v23, 0.0 }
 0x3fb   :  { %v1025_v28 = vmax.f32 %v1007_v26, 0.0 }
 0x3fd   :  { %v1033_v29 = vpack.c.bf16 %v1025_v28, %v1024_v27 }
 0x3ff   :  { %1522 = vmatmul.mubr.bf16.gmra.mrb[52].mxu1 %v1033_v29 }
 0x4a2   :  { %v1511_v32 = vpop.f32.mrb[40].mxu1 }
 0x4a3   :  { %v1145_v33 = vadd.f32 %v1511_v32, %v1998_v31  ;;  %v1136_v34 = vpop.f32.mrb[41].mxu1 }
 0x4a4   :  { %v1137_v35 = vadd.f32 %v1136_v34, %v1998_v31  ;;  %v1512_v36 = vpop.f32.mrb[42].mxu1 }
 0x4a5   :  { %v1148_v62 = vadd.f32 %v1512_v36, %v1998_v31  ;;  %v1139_v37 = vpop.f32.mrb[43].mxu1  ;;  %v1201_v39 = vmax.f32 %v1145_v33, 0.0 }
 0x4a6   :  { %v1140_v38 = vadd.f32 %v1139_v37, %v1998_v31  ;;  %v1199_v41 = vmax.f32 %v1137_v35, 0.0  ;;  %v1637_v35 = vmov 839922192  }
 0x4a7   :  { %v1202_v40 = vmax.f32 %v1148_v62, 0.0  ;;  %v1229_v36 = vunpack.c.l.s4 %v1637_v35 }
 0x4a8   :  { %v1200_v42 = vmax.f32 %v1140_v38, 0.0  ;;  %v1226_v38 = vpop.permute.xlu0 %1225 }
 0x4a9   :  { %v1217_v43 = vpack.c.bf16 %v1202_v40, %v1201_v39  ;;  %v1230_v62 = vunpack.c.0.s8 %v1229_v36  ;;  %v1238_v40 = vsub.s32 3, %v1737_v24 }
 0x4aa   :  { %v1216_v15 = vpack.c.bf16 %v1200_v42, %v1199_v41 }
 0x4ab   :  { %v1249_v50 = vsel %vm1241_vm5, %v1217_v43, 0  ;;  %v1233_v37 = vsub.s32 %v1230_v62, %v1737_v24 }
 0x4ac   :  { %v1246_v44 = vsel %vm1241_vm5, %v1216_v15, 0 }
 0x4ad   :  { %1526 = vmatpush3.bf16.xpose.msra.mxu0 %v1246_v44  ;;  %v1234_v39 = vrot.slane %v1226_v38, %v1233_v37 }
 0x4ae   :  { %1527 = vmatprep.subr.bf16.mxu0 %v1635_v22 }
 0x4af   :  { %v1239_v41 = vrot.slane %v1234_v39, %v1238_v40 }
 0x4b2   :  { %v1515_v45 = vpop.f32.mrb[44].mxu1 }
 0x4b3   :  { %v1161_v46 = vadd.f32 %v1515_v45, %v1998_v31  ;;  %v1152_v47 = vpop.f32.mrb[45].mxu1 }
 0x4b4   :  { %v1153_v48 = vadd.f32 %v1152_v47, %v1998_v31  ;;  %v1516_v49 = vpop.f32.mrb[46].mxu1 }
 0x4b5   :  { %v1164_v51 = vadd.f32 %v1516_v49, %v1998_v31  ;;  %v1155_v52 = vpop.f32.mrb[47].mxu1  ;;  %1528 = vmatpush3.bf16.xpose.msra.mxu0 %v1249_v50  ;;  %v1205_v54 = vmax.f32 %v1161_v46, 0.0 }
 0x4b6   :  { %v1156_v53 = vadd.f32 %v1155_v52, %v1998_v31  ;;  %1529 = vmatprep.subr.bf16.mxu0 %v1635_v22  ;;  %v1203_v56 = vmax.f32 %v1153_v48, 0.0 }
 0x4b7   :  { %v1206_v55 = vmax.f32 %v1164_v51, 0.0 }
 0x4b8   :  { %v1204_v57 = vmax.f32 %v1156_v53, 0.0 }
 0x4b9   :  { %v1219_v58 = vpack.c.bf16 %v1206_v55, %v1205_v54 }
 0x4ba   :  { %v1218_v59 = vpack.c.bf16 %v1204_v57, %v1203_v56 }
 0x4bb   :  { %v1255_v3 = vsel %vm1241_vm5, %v1219_v58, 0 }
 0x4bc   :  { %v1252_v60 = vsel %vm1241_vm5, %v1218_v59, 0 }
 0x4bd   :  { %1530 = vmatpush3.bf16.xpose.msra.mxu0 %v1252_v60 }
 0x4be   :  { %1531 = vmatprep.subr.bf16.mxu0 %v1635_v22 }
 0x4c2   :  { %v1519_v61 = vpop.f32.mrb[48].mxu1 }
 0x4c3   :  { %v1177_v63 = vadd.f32 %v1519_v61, %v1998_v31  ;;  %v1168_v0 = vpop.f32.mrb[49].mxu1 }
 0x4c4   :  { %v1169_v1 = vadd.f32 %v1168_v0, %v1998_v31  ;;  %v1520_v2 = vpop.f32.mrb[50].mxu1 }
 0x4c5   :  { %v1180_v4 = vadd.f32 %v1520_v2, %v1998_v31  ;;  %v1171_v5 = vpop.f32.mrb[51].mxu1  ;;  %1532 = vmatpush3.bf16.xpose.msra.mxu0 %v1255_v3  ;;  %v1209_v7 = vmax.f32 %v1177_v63, 0.0 }
 0x4c6   :  { %v1172_v6 = vadd.f32 %v1171_v5, %v1998_v31  ;;  %1533 = vmatprep.subr.bf16.mxu0 %v1635_v22  ;;  %v1207_v9 = vmax.f32 %v1169_v1, 0.0 }
 0x4c7   :  { %v1210_v8 = vmax.f32 %v1180_v4, 0.0 }
 0x4c8   :  { %v1208_v10 = vmax.f32 %v1172_v6, 0.0 }
 0x4c9   :  { %v1221_v11 = vpack.c.bf16 %v1210_v8, %v1209_v7 }
 0x4ca   :  { %v1220_v12 = vpack.c.bf16 %v1208_v10, %v1207_v9 }
 0x4cb   :  { %v1261_v20 = vsel %vm1241_vm5, %v1221_v11, 0 }
 0x4cc   :  { %v1258_v13 = vsel %vm1241_vm5, %v1220_v12, 0 }
 0x4cd   :  { %1534 = vmatpush3.bf16.xpose.msra.mxu0 %v1258_v13 }
 0x4ce   :  { %1535 = vmatprep.subr.bf16.mxu0 %v1635_v22 }
 0x4d2   :  { %v1523_v14 = vpop.f32.mrb[52].mxu1 }
 0x4d3   :  { %v1193_v16 = vadd.f32 %v1523_v14, %v1998_v31  ;;  %v1184_v17 = vpop.f32.mrb[53].mxu1 }
 0x4d4   :  { %v1185_v18 = vadd.f32 %v1184_v17, %v1998_v31  ;;  %v1524_v19 = vpop.f32.mrb[54].mxu1 }
 0x4d5   :  { %v1196_v21 = vadd.f32 %v1524_v19, %v1998_v31  ;;  %v1187_v23 = vpop.f32.mrb[55].mxu1  ;;  %1536 = vmatpush3.bf16.xpose.msra.mxu0 %v1261_v20  ;;  %v1213_v26 = vmax.f32 %v1193_v16, 0.0 }
 0x4d6   :  { %v1188_v25 = vadd.f32 %v1187_v23, %v1998_v31  ;;  %1537 = vmatprep.subr.bf16.mxu0 %v1635_v22  ;;  %v1211_v28 = vmax.f32 %v1185_v18, 0.0  ;;  %v1215_v31 = vld [vmem:[%s2047_s6] sm:$0x1] }
 0x4d7   :  { %v1214_v27 = vmax.f32 %v1196_v21, 0.0 }
 0x4d8   :  { %v1212_v29 = vmax.f32 %v1188_v25, 0.0 }
 0x4d9   :  { %v1223_v30 = vpack.c.bf16 %v1214_v27, %v1213_v26 }
 0x4da   :  { %v1222_v32 = vpack.c.bf16 %v1212_v29, %v1211_v28 }
 0x4db   :  { %v1267_v34 = vsel %vm1241_vm5, %v1223_v30, 0 }
 0x4dc   :  { %v1264_v33 = vsel %vm1241_vm5, %v1222_v32, 0 }
 0x4dd   :  { %1538 = vmatpush3.bf16.xpose.msra.mxu0 %v1264_v33 }
 0x4de   :  { %1539 = vmatprep.subr.bf16.mxu0 %v1635_v22 }
 0x4e5   :  { %1540 = vmatpush3.bf16.xpose.msra.mxu0 %v1267_v34 }
 0x4ec   :  { %1542 = vmatmul.mubr.msk.bf16.vlgmr.msra.gmra.mrb[36].mxu0 %vm1241_vm5, %v1215_v31 }
 0x5bf   :  { %v1303_v22 = vpop.f32.mrb[36].mxu0 }
 0x5c0   :  { %v1304_v42 = vadd.f32 %v1303_v22, %v1239_v41  ;;  %v1543_v43 = vpop.f32.mrb[37].mxu0 }
 0x5c1   :  { %v1306_v15 = vpop.f32.mrb[38].mxu0 }
 0x5c2   :  { %1309 = vst [vmem:[%s2048_s8] sm:$0x1] %v1304_v42  ;;  %v1544_v44 = vpop.f32.mrb[39].mxu0 }

</bundles_post_ra>
